<compile_context>
chip_gen: v6e
topology: v6e:2x2x1
jax: 0.10.0
libtpu: 0.0.40
codegen_flags: <defaults>
</compile_context>

<pallas_src>
import jax
import jax.numpy as jnp
from jax.experimental import pallas as pl
from jax.experimental.pallas import tpu as pltpu

LANE = 128


def _round_up(x, m):
    return (x + m - 1) // m * m


# ----------------------------------------------------------------------------
# Kernel
# ----------------------------------------------------------------------------
def encoder_gru_seq_kernel(tok_ref,       # (T,) int32, scalar-prefetched (SMEM)
                           emb_row_ref,   # (1, 1, Hp)  gathered embedding row
                           h0_ref,        # (1, Hp)     initial hidden state
                           wih_ref,       # (Hp, 3Hp)   W_ih^T, gate-tiled [r|z|n]
                           whh_ref,       # (Hp, 3Hp)   W_hh^T, gate-tiled [r|z|n]
                           ball_ref,      # (1, 3Hp)    b_ir+b_hr | b_iz+b_hz | b_in
                           bhn_ref,       # (1, Hp)     b_hn
                           out_ref,       # (1, 1, Hp)  per-step GRU output block
                           h_scratch):    # VMEM (1, Hp) carried hidden state
    del tok_ref  # gather is done by the index_map; the ref itself is unused
    Hp = h0_ref.shape[1]
    step = pl.program_id(0)

    @pl.when(step == 0)
    def _init():
        h_scratch[...] = h0_ref[...]

    x = emb_row_ref[0]          # (1, Hp) embedded token
    h = h_scratch[...]          # (1, Hp) previous hidden

    w_dtype = wih_ref.dtype     # weights may be bf16; accumulate in f32
    gi = jnp.dot(x.astype(w_dtype), wih_ref[...],
                 preferred_element_type=jnp.float32) + ball_ref[...]
    gh = jnp.dot(h.astype(w_dtype), whh_ref[...],
                 preferred_element_type=jnp.float32)

    # Gate slices are 128-lane-aligned tile views (no lane shuffles).
    i_r, i_z, i_n = gi[:, 0:Hp], gi[:, Hp:2 * Hp], gi[:, 2 * Hp:3 * Hp]
    h_r, h_z, h_n = gh[:, 0:Hp], gh[:, Hp:2 * Hp], gh[:, 2 * Hp:3 * Hp]

    r = jax.nn.sigmoid(i_r + h_r)                 # r/z biases pre-folded into gi
    z = jax.nn.sigmoid(i_z + h_z)
    n = jnp.tanh(i_n + r * (h_n + bhn_ref[...]))  # PyTorch: r * (W_hn h + b_hn)
    h_new = n + z * (h - n)                       # == (1 - z) * n + z * h

    h_scratch[...] = h_new
    out_ref[0] = h_new


# ----------------------------------------------------------------------------
# Wrappers
# ----------------------------------------------------------------------------
def encoder_rnn_run_sequence(tokens, hidden, kparams):
    """Run the encoder over a whole token sequence in one pallas_call.

    tokens: (T,) int32 token ids
    hidden: (1, 1, H) f32 initial hidden state
    returns (outputs (T, 1, H), hidden_new (1, 1, H))
    """
    T = tokens.shape[0]
    H = kparams["hidden_size"]
    Hp = kparams["Hp"]

    h0 = jnp.zeros((1, Hp), jnp.float32).at[:, :H].set(hidden.reshape(1, H))

    grid_spec = pltpu.PrefetchScalarGridSpec(
        num_scalar_prefetch=1,
        grid=(T,),
        in_specs=[
            # Embedding row gather: token id selects the block row.
            pl.BlockSpec((1, 1, Hp), lambda i, tok: (tok[i], 0, 0)),
            # Initial hidden + weights/biases: VMEM-resident across the grid.
            pl.BlockSpec((1, Hp), lambda i, tok: (0, 0)),
            pl.BlockSpec((Hp, 3 * Hp), lambda i, tok: (0, 0)),
            pl.BlockSpec((Hp, 3 * Hp), lambda i, tok: (0, 0)),
            pl.BlockSpec((1, 3 * Hp), lambda i, tok: (0, 0)),
            pl.BlockSpec((1, Hp), lambda i, tok: (0, 0)),
        ],
        out_specs=pl.BlockSpec((1, 1, Hp), lambda i, tok: (i, 0, 0)),
        scratch_shapes=[pltpu.VMEM((1, Hp), jnp.float32)],
    )

    outputs_p = pl.pallas_call(
        encoder_gru_seq_kernel,
        grid_spec=grid_spec,
        out_shape=jax.ShapeDtypeStruct((T, 1, Hp), jnp.float32),
        compiler_params=pltpu.CompilerParams(
            # Recurrent axis: hidden state is carried -> must be "arbitrary".
            dimension_semantics=("arbitrary",)),
    )(tokens.astype(jnp.int32), kparams["emb"], h0,
      kparams["wih"], kparams["whh"], kparams["b_all"], kparams["b_hn"])

    outputs = outputs_p[:, :, :H]                 # (T, 1, H) valid lanes
    hidden_new = outputs[-1].reshape(1, 1, H)     # final hidden == last output
    return outputs, hidden_new


def encoder_rnn_forward(token, hidden, kparams):
    """Module-faithful EncoderRNN.forward(input, hidden): a single token step.

    token:  (1,) int32; hidden: (1, 1, H)
    returns (output (1, 1, H), hidden_new (1, 1, H))
    """
    outputs, hidden_new = encoder_rnn_run_sequence(token.reshape(1), hidden, kparams)
    return outputs.reshape(1, 1, -1), hidden_new


# ----------------------------------------------------------------------------
# Parameters (PyTorch layout) and kernel-layout preparation
# ----------------------------------------------------------------------------
def init_params(key, input_size, hidden_size):
    """PyTorch-shaped parameters: emb (V,H), w_ih/w_hh (3H,H), b_ih/b_hh (3H,)."""
    H = hidden_size
    k_emb, k_wih, k_whh, k_bih, k_bhh = jax.random.split(key, 5)
    bound = 1.0 / jnp.sqrt(jnp.float32(H))
    return {
        "emb": jax.random.normal(k_emb, (input_size, H), jnp.float32),
        "w_ih": jax.random.uniform(k_wih, (3 * H, H), jnp.float32, -bound, bound),
        "w_hh": jax.random.uniform(k_whh, (3 * H, H), jnp.float32, -bound, bound),
        "b_ih": jax.random.uniform(k_bih, (3 * H,), jnp.float32, -bound, bound),
        "b_hh": jax.random.uniform(k_bhh, (3 * H,), jnp.float32, -bound, bound),
    }


def prepare_kernel_params(params, hidden_size, weight_dtype=jnp.float32):
    """Pad/realign parameters for the kernel.

    - H is padded to Hp = round_up(H, 128) so every gate gets its own
      128-lane-aligned column tile: columns [g*Hp, g*Hp+H) hold gate g.
    - b_ih + b_hh are folded for r/z; b_hn kept separate for the n gate.
    - weight_dtype=jnp.bfloat16 halves weight DMA/VMEM on v6e/v7x
      (gate math stays f32, which keeps v5e happy).
    """
    H = hidden_size
    Hp = _round_up(max(H, LANE), LANE)
    V = params["emb"].shape[0]

    emb_p = jnp.zeros((V, 1, Hp), jnp.float32).at[:, 0, :H].set(params["emb"])

    wih_p = jnp.zeros((Hp, 3 * Hp), jnp.float32)
    whh_p = jnp.zeros((Hp, 3 * Hp), jnp.float32)
    b_all = jnp.zeros((1, 3 * Hp), jnp.float32)
    for g in range(3):  # PyTorch gate order [r, z, n]
        wih_p = wih_p.at[:H, g * Hp:g * Hp + H].set(
            params["w_ih"][g * H:(g + 1) * H, :].T)
        whh_p = whh_p.at[:H, g * Hp:g * Hp + H].set(
            params["w_hh"][g * H:(g + 1) * H, :].T)
        bg = params["b_ih"][g * H:(g + 1) * H]
        if g < 2:  # fold hidden bias into input bias for r and z gates
            bg = bg + params["b_hh"][g * H:(g + 1) * H]
        b_all = b_all.at[0, g * Hp:g * Hp + H].set(bg)
    b_hn = jnp.zeros((1, Hp), jnp.float32).at[0, :H].set(params["b_hh"][2 * H:3 * H])

    return {
        "hidden_size": H,
        "Hp": Hp,
        "emb": emb_p,
        "wih": wih_p.astype(weight_dtype),
        "whh": whh_p.astype(weight_dtype),
        "b_all": b_all,
        "b_hn": b_hn,
    }


# ----------------------------------------------------------------------------
# Pure-JAX reference (PyTorch GRU semantics)
# ----------------------------------------------------------------------------
def _reference_sequence(tokens, hidden, params):
    H = hidden.shape[-1]
    h = hidden.reshape(1, H)
    outs = []
    for t in range(tokens.shape[0]):
        x = params["emb"][tokens[t]].reshape(1, H)
        gi = x @ params["w_ih"].T + params["b_ih"]
        gh = h @ params["w_hh"].T + params["b_hh"]
        i_r, i_z, i_n = gi[:, :H], gi[:, H:2 * H], gi[:, 2 * H:]
        h_r, h_z, h_n = gh[:, :H], gh[:, H:2 * H], gh[:, 2 * H:]
        r = jax.nn.sigmoid(i_r + h_r)
        z = jax.nn.sigmoid(i_z + h_z)
        n = jnp.tanh(i_n + r * h_n)
        h = (1.0 - z) * n + z * h
        outs.append(h)
    return jnp.stack(outs, axis=0), h.reshape(1, 1, H)  # (T, 1, H), (1, 1, H)


if __name__ == "__main__":
    INPUT_SIZE = 64   # vocab size
    HIDDEN = 32
    SEQ_LEN = 8

    key = jax.random.PRNGKey(0)
    k_param, k_tok, k_hid = jax.random.split(key, 3)

    params = init_params(k_param, INPUT_SIZE, HIDDEN)
    kparams = prepare_kernel_params(params, HIDDEN)   # f32 weights for exact check

    tokens = jax.random.randint(k_tok, (SEQ_LEN,), 0, INPUT_SIZE, dtype=jnp.int32)
    hidden0 = jnp.zeros((1, 1, HIDDEN), jnp.float32)  # get_initial_hidden_state()

    # (a) Whole input sequence in ONE pallas_call (recurrence inside the kernel).
    outs, h_final = encoder_rnn_run_sequence(tokens, hidden0, kparams)
    jax.block_until_ready((outs, h_final))

    ref_outs, ref_h = _reference_sequence(tokens, hidden0, params)
    assert outs.shape == (SEQ_LEN, 1, HIDDEN) and h_final.shape == (1, 1, HIDDEN)
    assert jnp.allclose(outs, ref_outs, rtol=1e-4, atol=1e-4), "sequence output mismatch"
    assert jnp.allclose(h_final, ref_h, rtol=1e-4, atol=1e-4), "final hidden mismatch"

    # (b) Module-faithful single-step forward(input, hidden) (T == 1 case).
    hidden_r = jax.random.normal(k_hid, (1, 1, HIDDEN), dtype=jnp.float32)
    out1, h1 = encoder_rnn_forward(tokens[:1], hidden_r, kparams)
    jax.block_until_ready((out1, h1))
    ref_o1, ref_h1 = _reference_sequence(tokens[:1], hidden_r, params)
    assert out1.shape == (1, 1, HIDDEN) and h1.shape == (1, 1, HIDDEN)
    assert jnp.allclose(out1, ref_o1.reshape(1, 1, HIDDEN), rtol=1e-4, atol=1e-4)
    assert jnp.allclose(h1, ref_h1, rtol=1e-4, atol=1e-4)

    print("KERNEL_OK")
</pallas_src>

<mosaic_0001>
module attributes {stable_mosaic.version = 11 : i64} {
  func.func @encoder_gru_seq_kernel(%arg0: i32, %arg1: memref<8xi32, #tpu.memory_space<smem>>, %arg2: memref<1x1x128xf32, #tpu.memory_space<vmem>>, %arg3: memref<1x128xf32, #tpu.memory_space<vmem>>, %arg4: memref<128x384xf32, #tpu.memory_space<vmem>>, %arg5: memref<128x384xf32, #tpu.memory_space<vmem>>, %arg6: memref<1x384xf32, #tpu.memory_space<vmem>>, %arg7: memref<1x128xf32, #tpu.memory_space<vmem>>, %arg8: memref<1x1x128xf32, #tpu.memory_space<vmem>>, %arg9: memref<1x128xf32, #tpu.memory_space<vmem>>) attributes {dimension_semantics = [#tpu.dimension_semantics<arbitrary>], iteration_bounds = array<i64: 8>, scalar_prefetch = 1 : i64, scratch_operands = 1 : i64, tpu.core_type = #tpu.core_type<tc>, window_params = [{transform_indices = @transform_0, window_bounds = array<i64: 1, 1, 128>}, {pipeline_mode = #tpu.pipeline_mode<synchronous>, transform_indices = @transform_1, window_bounds = array<i64: 1, 128>}, {pipeline_mode = #tpu.pipeline_mode<synchronous>, transform_indices = @transform_2, window_bounds = array<i64: 128, 384>}, {pipeline_mode = #tpu.pipeline_mode<synchronous>, transform_indices = @transform_3, window_bounds = array<i64: 128, 384>}, {pipeline_mode = #tpu.pipeline_mode<synchronous>, transform_indices = @transform_4, window_bounds = array<i64: 1, 384>}, {pipeline_mode = #tpu.pipeline_mode<synchronous>, transform_indices = @transform_5, window_bounds = array<i64: 1, 128>}, {transform_indices = @transform_6, window_bounds = array<i64: 1, 1, 128>}]} {
    %c0_i32 = arith.constant 0 : i32
    %0 = arith.cmpi eq, %arg0, %c0_i32 : i32
    %1 = arith.extui %0 : i1 to i32
    %c0_i32_0 = arith.constant 0 : i32
    %2 = arith.cmpi ne, %1, %c0_i32_0 : i32
    scf.if %2 {
      %c0_21 = arith.constant 0 : index
      %c0_22 = arith.constant 0 : index
      %42 = vector.load %arg3[%c0_21, %c0_22] : memref<1x128xf32, #tpu.memory_space<vmem>>, vector<1x128xf32>
      %c0_23 = arith.constant 0 : index
      %c0_24 = arith.constant 0 : index
      %43 = vector.load %arg9[%c0_23, %c0_24] : memref<1x128xf32, #tpu.memory_space<vmem>>, vector<1x128xf32>
      tpu.vector_store %arg9[%c0_23, %c0_24], %42 {strides = array<i32>} : memref<1x128xf32, #tpu.memory_space<vmem>>, vector<1x128xf32>,
    } else {
    }
    %c0 = arith.constant 0 : index
    %c0_1 = arith.constant 0 : index
    %c0_2 = arith.constant 0 : index
    %3 = vector.load %arg2[%c0, %c0_1, %c0_2] : memref<1x1x128xf32, #tpu.memory_space<vmem>>, vector<1x1x128xf32>
    %4 = vector.shape_cast %3 : vector<1x1x128xf32> to vector<1x128xf32>
    %c0_3 = arith.constant 0 : index
    %c0_4 = arith.constant 0 : index
    %5 = vector.load %arg9[%c0_3, %c0_4] : memref<1x128xf32, #tpu.memory_space<vmem>>, vector<1x128xf32>
    %c0_5 = arith.constant 0 : index
    %c0_6 = arith.constant 0 : index
    %6 = vector.load %arg4[%c0_5, %c0_6] : memref<128x384xf32, #tpu.memory_space<vmem>>, vector<128x384xf32>
    %cst = arith.constant dense<0.000000e+00> : vector<1x384xf32>
    %7 = tpu.matmul %4, %6, %cst {dimension_numbers = #tpu.dot_dimension_numbers<[1], [0], [0], [1], [0, 0, 1, 1], [], []>} : vector<1x128xf32>, vector<128x384xf32>, vector<1x384xf32> -> vector<1x384xf32>
    %c0_7 = arith.constant 0 : index
    %c0_8 = arith.constant 0 : index
    %8 = vector.load %arg6[%c0_7, %c0_8] : memref<1x384xf32, #tpu.memory_space<vmem>>, vector<1x384xf32>
    %9 = arith.addf %7, %8 : vector<1x384xf32>
    %c0_9 = arith.constant 0 : index
    %c0_10 = arith.constant 0 : index
    %10 = vector.load %arg5[%c0_9, %c0_10] : memref<128x384xf32, #tpu.memory_space<vmem>>, vector<128x384xf32>
    %cst_11 = arith.constant dense<0.000000e+00> : vector<1x384xf32>
    %11 = tpu.matmul %5, %10, %cst_11 {dimension_numbers = #tpu.dot_dimension_numbers<[1], [0], [0], [1], [0, 0, 1, 1], [], []>} : vector<1x128xf32>, vector<128x384xf32>, vector<1x384xf32> -> vector<1x384xf32>
    %12 = vector.extract_strided_slice %9 {offsets = [0, 0], sizes = [1, 128], strides = [1, 1]} : vector<1x384xf32> to vector<1x128xf32>
    %13 = vector.extract_strided_slice %9 {offsets = [0, 128], sizes = [1, 128], strides = [1, 1]} : vector<1x384xf32> to vector<1x128xf32>
    %14 = vector.extract_strided_slice %9 {offsets = [0, 256], sizes = [1, 128], strides = [1, 1]} : vector<1x384xf32> to vector<1x128xf32>
    %15 = vector.extract_strided_slice %11 {offsets = [0, 0], sizes = [1, 128], strides = [1, 1]} : vector<1x384xf32> to vector<1x128xf32>
    %16 = vector.extract_strided_slice %11 {offsets = [0, 128], sizes = [1, 128], strides = [1, 1]} : vector<1x384xf32> to vector<1x128xf32>
    %17 = vector.extract_strided_slice %11 {offsets = [0, 256], sizes = [1, 128], strides = [1, 1]} : vector<1x384xf32> to vector<1x128xf32>
    %18 = arith.addf %12, %15 : vector<1x128xf32>
    %19 = arith.negf %18 : vector<1x128xf32>
    %20 = math.exp %19 : vector<1x128xf32>
    %cst_12 = arith.constant 1.000000e+00 : f32
    %21 = vector.broadcast %cst_12 : f32 to vector<1x128xf32>
    %22 = arith.addf %21, %20 : vector<1x128xf32>
    %23 = arith.divf %21, %22 : vector<1x128xf32>
    %24 = arith.addf %13, %16 : vector<1x128xf32>
    %25 = arith.negf %24 : vector<1x128xf32>
    %26 = math.exp %25 : vector<1x128xf32>
    %cst_13 = arith.constant 1.000000e+00 : f32
    %27 = vector.broadcast %cst_13 : f32 to vector<1x128xf32>
    %28 = arith.addf %27, %26 : vector<1x128xf32>
    %29 = arith.divf %27, %28 : vector<1x128xf32>
    %c0_14 = arith.constant 0 : index
    %c0_15 = arith.constant 0 : index
    %30 = vector.load %arg7[%c0_14, %c0_15] : memref<1x128xf32, #tpu.memory_space<vmem>>, vector<1x128xf32>
    %31 = arith.addf %17, %30 : vector<1x128xf32>
    %32 = arith.mulf %23, %31 : vector<1x128xf32>
    %33 = arith.addf %14, %32 : vector<1x128xf32>
    %34 = math.tanh %33 : vector<1x128xf32>
    %35 = arith.subf %5, %34 : vector<1x128xf32>
    %36 = arith.mulf %29, %35 : vector<1x128xf32>
    %37 = arith.addf %34, %36 : vector<1x128xf32>
    %c0_16 = arith.constant 0 : index
    %c0_17 = arith.constant 0 : index
    %38 = vector.load %arg9[%c0_16, %c0_17] : memref<1x128xf32, #tpu.memory_space<vmem>>, vector<1x128xf32>
    tpu.vector_store %arg9[%c0_16, %c0_17], %37 {strides = array<i32>} : memref<1x128xf32, #tpu.memory_space<vmem>>, vector<1x128xf32>,
    %c0_18 = arith.constant 0 : index
    %c0_19 = arith.constant 0 : index
    %c0_20 = arith.constant 0 : index
    %39 = vector.load %arg8[%c0_18, %c0_19, %c0_20] : memref<1x1x128xf32, #tpu.memory_space<vmem>>, vector<1x1x128xf32>
    %40 = vector.shape_cast %39 : vector<1x1x128xf32> to vector<1x128xf32>
    %41 = vector.shape_cast %37 : vector<1x128xf32> to vector<1x1x128xf32>
    tpu.vector_store %arg8[%c0_18, %c0_19, %c0_20], %41 {strides = array<i32>} : memref<1x1x128xf32, #tpu.memory_space<vmem>>, vector<1x1x128xf32>,
    return
  }
  func.func @transform_0(%arg0: i32, %arg1: memref<8xi32, #tpu.memory_space<smem>>) -> (i32, i32, i32) {
    %0 = arith.index_cast %arg0 : i32 to index
    %1 = memref.load %arg1[%0] : memref<8xi32, #tpu.memory_space<smem>>
    %c0_i32 = arith.constant 0 : i32
    %c0_i32_0 = arith.constant 0 : i32
    %c0_i32_1 = arith.constant 0 : i32
    return %1, %c0_i32, %c0_i32_0 : i32, i32, i32
  }
  func.func @transform_1(%arg0: i32, %arg1: memref<8xi32, #tpu.memory_space<smem>>) -> (i32, i32) {
    %c0_i32 = arith.constant 0 : i32
    %c0_i32_0 = arith.constant 0 : i32
    %c0_i32_1 = arith.constant 0 : i32
    return %c0_i32, %c0_i32_0 : i32, i32
  }
  func.func @transform_2(%arg0: i32, %arg1: memref<8xi32, #tpu.memory_space<smem>>) -> (i32, i32) {
    %c0_i32 = arith.constant 0 : i32
    %c0_i32_0 = arith.constant 0 : i32
    %c0_i32_1 = arith.constant 0 : i32
    return %c0_i32, %c0_i32_0 : i32, i32
  }
  func.func @transform_3(%arg0: i32, %arg1: memref<8xi32, #tpu.memory_space<smem>>) -> (i32, i32) {
    %c0_i32 = arith.constant 0 : i32
    %c0_i32_0 = arith.constant 0 : i32
    %c0_i32_1 = arith.constant 0 : i32
    return %c0_i32, %c0_i32_0 : i32, i32
  }
  func.func @transform_4(%arg0: i32, %arg1: memref<8xi32, #tpu.memory_space<smem>>) -> (i32, i32) {
    %c0_i32 = arith.constant 0 : i32
    %c0_i32_0 = arith.constant 0 : i32
    %c0_i32_1 = arith.constant 0 : i32
    return %c0_i32, %c0_i32_0 : i32, i32
  }
  func.func @transform_5(%arg0: i32, %arg1: memref<8xi32, #tpu.memory_space<smem>>) -> (i32, i32) {
    %c0_i32 = arith.constant 0 : i32
    %c0_i32_0 = arith.constant 0 : i32
    %c0_i32_1 = arith.constant 0 : i32
    return %c0_i32, %c0_i32_0 : i32, i32
  }
  func.func @transform_6(%arg0: i32, %arg1: memref<8xi32, #tpu.memory_space<smem>>) -> (i32, i32, i32) {
    %c0_i32 = arith.constant 0 : i32
    %c0_i32_0 = arith.constant 0 : i32
    %c0_i32_1 = arith.constant 0 : i32
    return %arg0, %c0_i32, %c0_i32_0 : i32, i32, i32
  }
}

</mosaic_0001>

<bundles_post_ra>
// kernel: tpu_custom_call.1
= control target key start
LH: loop header
LB: loop body
LE: loop exit
PB: predicated region body
PF: predicated region fallthrough
CT: control target
= control target key end

     0   :  { %s1236_s24 = smov [#allocation4]   ;;  %s1548_s0 = inlined_call_operand.hbm [shape: s32[8], index: 0, kind: input, shape index: {}]   ;;  %s1549_s1 = inlined_call_operand.hbm [shape: f32[64,1,128], index: 1, kind: input, shape index: {}]   ;;  %s1550_s2 = inlined_call_operand.vmem [shape: f32[1,128], index: 2, kind: input, shape index: {}]   ;;  %s1551_s3 = inlined_call_operand.hbm [shape: f32[128,384], index: 3, kind: input, shape index: {}]   ;;  %s1552_s4 = inlined_call_operand.hbm [shape: f32[128,384], index: 4, kind: input, shape index: {}]   ;;  %s1553_s5 = inlined_call_operand.vmem [shape: f32[1,384], index: 5, kind: input, shape index: {}]   ;;  %s1554_s6 = inlined_call_operand.vmem [shape: f32[1,128], index: 6, kind: input, shape index: {}]   ;;  %s1555_s7 = inlined_call_operand.hbm [shape: f32[8,1,128], index: 7, kind: output, shape index: {}]  }
   0x1   :  { %1561 = sst [smem:[#allocation21_spill]] %s1551_s3 }
   0x2   :  { %1562 = sst [smem:[#allocation22_spill]] %s1552_s4 }
   0x3   :  { %13 = dma.hbm_to_smem %s1548_s0, 16, %s1236_s24, [#allocation3] }
   0x4   :  { %1194 = dma.done.wait [#allocation3], 16 }
   0x5   :  { %1195 = vsyncadd [#allocation3], 4294967280 }
   0x6   :  { %15 = sfence }
   0x7   :  { %16 = vsyncpa [#allocation6], 0 }
   0x8   :  { %18 = vsyncpa [#allocation6 + $0x1], 0 }
   0x9   :  { %19 = vsyncpa [#allocation9], 0 }
   0xa   :  { %20 = vsyncpa [#allocation7], 0 }
   0xb   :  { %22 = vsyncpa [#allocation7 + $0x1], 0  ;;  %s1288_s27 = smov 0   ;;  %s1290_s28 = smov 0  }
   0xc   :  { %s1292_s29 = smov 0   ;;  %s1294_s30 = smov 0  }
   0xd   :  { %s1296_s8 = smov 0   ;;  %s1298_s9 = smov 0  }
   0xe   :  { %s1300_s0 = smov 0  }
   0xf LB: > { %1563 = sst [smem:[#allocation18_spill]] %s1230_s9  ;;  %s1322_s10 = sadd.s32 4294967295, %s1234_s0   ;;  %s1234_s0 = sphi %s1300_s0, %s1589_s0   ;;  %s1230_s9 = sphi %s1298_s9, %s1583_s9   ;;  %s1226_s8 = sphi %s1296_s8, %s1588_s8   ;;  %s1222_s30 = sphi %s1294_s30, %s1587_s30   ;;  %s1218_s29 = sphi %s1292_s29, %s1586_s29   ;;  %s1214_s28 = sphi %s1290_s28, %s1585_s28   ;;  %s1210_s27 = sphi %s1288_s27, %s1584_s27  }
  0x10   : > { %s823_s11 = sadd.s32 4294967294, %s1234_s0   ;;  %s1326_s12 = sadd.s32 1, %s1234_s0  }
  0x11   : > { %p50_p0 = scmp.ne.s32.totalorder %s1226_s8, %s1222_s30  ;;  %p1556_p1 = scmp.eq.s32.totalorder %s1322_s10, 0 }
  0x12   : > { %s165_s13 = ssub.s32 %s1234_s0, %s1326_s12  ;;  %s168_s14 = sadd.s32 1, %s1218_s29 }
  0x13   : > { %p166_p2 = scmp.eq.s32.totalorder %s165_s13, 0  ;;  %p1335_p3 = por %p1556_p1, %p50_p0 }
  0x14   : > { %p178_p4 = scmp.ne.s32.totalorder %s1218_s29, %s1214_s28  ;;  %p179_p5 = scmp.eq.s32.totalorder %s1322_s10, 7 }
  0x15   : > { %s1564_s15 = scalar_select %p1335_p3, 1, 0 }
  0x16   : > { %s1342_s16 = scalar_select %p166_p2, %s1218_s29, %s168_s14  }
  0x17   : > { %p184_p6 = scmp.ne.s32.totalorder %s1214_s28, %s1210_s27  ;;  %p185_p7 = scmp.eq.s32.totalorder %s823_s11, 7 }
  0x18   : > { %1565 = sst [smem:[#allocation19_spill]] %s1342_s16  ;;  %p824_p8 = scmp.ge.s32.totalorder %s1234_s0, 1 }
  0x19   : > { %p1348_p9 = por %p179_p5, %p178_p4  ;;  %p192_p10 = scmp.lt.s32.totalorder %s1234_s0, 9 }
  0x1a   : > { %p1353_p11 = por %p185_p7, %p184_p6  ;;  %s1237_s20 = smov [#allocation8]  }
  0x1b   : > { %s1566_s17 = scalar_select %p1348_p9, 1, 0 }
  0x1c   : > { %s1567_s18 = scalar_select %p1353_p11, 1, 0 }
  0x1d   : > { %p1358_p13 = pnand %p824_p8, %p192_p10  ;;  %s207_s21 = sshll.u32 %s1237_s20, 4  ;;  %s208_s21 = int_to_ptr.vmem [resolvable:$true] %s207_s21 }
  0x1e   : > { %s1238_s23 = smov [#allocation10]   ;;  %s1071_s25 = scalar_lea.vmem %s208_s21, 6144 }
  0x1f   : > { %s1568_s19 = scalar_select %p1358_p13, 1, 0 }
  0x20   : > { %p956_p0 = pneg %p1358_p13  ;;  %s220_s24 = sshll.u32 %s1238_s23, 4  ;;  %s221_s24 = int_to_ptr.vmem [resolvable:$true] %s220_s24 }
  0x21   : > { %p1072_p5 = scmp.ne.s32.totalorder %s208_s21, %s1071_s25  ;;  %p1079_p8 = scmp.lt.s32.totalorder %s208_s21, %s208_s21 }
  0x22   : > { %p1366_p2 = pnand %p956_p0, %p1556_p1  ;;  %p1080_p10 = scmp.lt.s32.totalorder %s1071_s25, %s1071_s25 }
  0x24   : > { %p1062_p4 = pneg %p1366_p2  ;;  %p1081_p12 = por %p1080_p10, %p1079_p8 }
  0x26   : > { %p1074_p6 = pnand %p1072_p5, %p1062_p4 }
  0x28   : > { %p1075_p7 = pneg %p1074_p6 }
  0x2a   : > { %p1082_p0 = pnand %p1081_p12, %p1075_p7 }
  0x2c   : > { %1085 = shalt.err (!%p1082_p0)
}
  0x2d   : > { %s1239_s26 = smov 384   ;;  %s1240_s30 = smov 24  }
  0x2e   : > { %s1570_s3 = sld [smem:[#allocation21_spill]]  ;;  %s1097_s14 = scalar_lea.vmem %s221_s24, 6144 }
  0x2f   : > { %p1098_p1 = scmp.ne.s32.totalorder %s221_s24, %s1097_s14  ;;  %p1105_p11 = scmp.lt.s32.totalorder %s221_s24, %s221_s24 }
  0x30   : > { %p1106_p9 = scmp.lt.s32.totalorder %s1097_s14, %s1097_s14 }
  0x31   : > { %p1100_p5 = pnand %p1098_p1, %p1062_p4 }
  0x32   : > { %p1107_p8 = por %p1106_p9, %p1105_p11 }
  0x33   : > { %p1101_p6 = pneg %p1100_p5 }
  0x34   : > { %959 = dma.hbm_to_vmem [thread:$0]  (!%p1366_p2), %s1570_s3, 6144, %s208_s21, [#allocation9], %s1239_s26, %s1239_s26, %s1240_s30  }
  0x35   : > { %p1108_p12 = pnand %p1107_p8, %p1101_p6 }
  0x37   : > { %1111 = shalt.err (!%p1108_p12)
}
  0x38   : > { %s1571_s4 = sld [smem:[#allocation22_spill]]  ;;  %p44_p1 = scmp.ne.s32.totalorder %s1230_s9, %s1226_s8 }
  0x39   : > { %s32_s21 = sld [smem:[#allocation4 + %s1234_s0]]  ;;  %p45_p9 = scmp.eq.s32.totalorder %s1234_s0, 0 }
  0x3a   : > { %s33_s25 = sld [smem:[#allocation4 + %s1326_s12]]  ;;  %s37_s22 = sadd.s32 1, %s1230_s9 }
  0x3b   : > { %p46_p11 = por %p45_p9, %p44_p1  ;;  %p975_p4 = scmp.lt.s32.totalorder %s1234_s0, 8 }
  0x3c   : > { %s240_s14 = sand.u32 1, %s1230_s9  }
  0x3d   : > { %s946_s11 = scalar_select %p46_p11, [#allocation4], [#allocation12] }
  0x3e   : > { %962 = dma.hbm_to_vmem [thread:$0]  (!%p1366_p2), %s1571_s4, 6144, %s221_s24, [#allocation9], %s1239_s26, %s1239_s26, %s1240_s30  }
  0x3f   : > { %s947_s20 = scalar_select %p46_p11, %s1234_s0, 0 }
  0x40   : > { %s34_s13 = ssub.s32 %s32_s21, %s33_s25  ;;  %s1591_s11 = smov (!%p975_p4, %s946_s11), [#allocation13] }
  0x41   : > { %p35_p7 = scmp.eq.s32.totalorder %s34_s13, 0  ;;  %s1593_s20 = smov (!%p975_p4, %s947_s20), 0 }
  0x42   : > { %p1400_p10 = pnand %p975_p4, %p46_p11  ;;  %s244_s24 = sld [smem:[%s1591_s11 + %s1593_s20]] }
  0x43   : > { %s1398_s23 = scalar_select %p35_p7, %s1230_s9, %s37_s22  }
  0x44   : > { %s243_s26 = scalar_lea.vmem [#allocation5], %s240_s14  ;;  %s241_s16 = scalar_lea.sflag [#allocation6], %s240_s14 }
  0x45   : > { %1572 = sst [smem:[#allocation20_spill]] %s1398_s23  ;;  %s251_s30 = sshll.u32 %s243_s26, 4  ;;  %s1404_s30 = int_to_ptr.vmem [resolvable:$true] %s251_s30 }
  0x46   : > { %p1114_p0 = pneg %p1400_p10  ;;  %s1117_s11 = scalar_lea.hbm %s1549_s1, 1024 }
  0x48   : > { %s828_s4 = sshll.u32 %s244_s24, 4 }
  0x49   : > { %s249_s13 = scalar_lea.hbm %s1549_s1, %s828_s4 }
  0x4a   : > { %s1112_s22 = scalar_lea.hbm %s249_s13, 16  ;;  %p1118_p8 = scmp.lt.s32.totalorder %s249_s13, %s1549_s1 }
  0x4b   : > { %p1113_p2 = scmp.ne.s32.totalorder %s249_s13, %s1112_s22  ;;  %p1119_p12 = scmp.lt.s32.totalorder %s1117_s11, %s1112_s22 }
  0x4d   : > { %p1115_p5 = pnand %p1114_p0, %p1113_p2  ;;  %p1120_p1 = por %p1119_p12, %p1118_p8 }
  0x4f   : > { %p1116_p6 = pneg %p1115_p5 }
  0x51   : > { %p1121_p9 = pnand %p1120_p1, %p1116_p6 }
  0x53   : > { %1124 = shalt.err (!%p1121_p9)
}
  0x54   : > { %s1125_s4 = scalar_lea.vmem %s1404_s30, 16  ;;  %s1241_s14 = smov [#allocation5]  }
  0x55   : > { %p1126_p11 = scmp.ne.s32.totalorder %s1404_s30, %s1125_s4  ;;  %s1130_s24 = sshll.u32 %s1241_s14, 4  ;;  %s1131_s24 = int_to_ptr.vmem [resolvable:$false] %s1130_s24 }
  0x56   : > { %s1132_s9 = scalar_lea.vmem %s1131_s24, 32  ;;  %p1133_p2 = scmp.lt.s32.totalorder %s1404_s30, %s1131_s24 }
  0x57   : > { %p1128_p4 = pnand %p1126_p11, %p1114_p0  ;;  %p1134_p5 = scmp.lt.s32.totalorder %s1132_s9, %s1125_s4 }
  0x59   : > { %p1129_p7 = pneg %p1128_p4  ;;  %p1135_p3 = por %p1134_p5, %p1133_p2 }
  0x5b   : > { %p1136_p13 = pnand %p1135_p3, %p1129_p7 }
  0x5d   : > { %1139 = shalt.err (!%p1136_p13)
}
  0x5e   : > { %968 = dma.hbm_to_vmem [thread:$0]  (!%p1400_p10), %s249_s13, 16, %s1404_s30, %s241_s16  }
  0x5f   : > { %p1574_p6 = scmp.ne.s32.totalorder %s1568_s19, 0 }
  0x60   : > { %s262_s23 = sand.u32 (!%p1574_p6), 1, %s1226_s8   ;;  %p1575_p0 = scmp.ne.s32.totalorder (!%p1574_p6), %s1564_s15, 0 }
  0x61   : > { %260 = sbr.rel (%p1574_p6) target bundleno = 444 (0x1bc), region = 44  ;;  %s263_s21 = scalar_lea.sflag (!%p1574_p6), [#allocation6], %s262_s23 }
  0x62   : > { %s1426_s25 = scalar_lea.vmem (!%p1574_p6), [#allocation5], %s262_s23 }
  0x66   : > { %1197 = dma.done.wait (%p1575_p0), %s263_s21, 16  }
  0x67   : > { %1199 = vsyncadd (%p1575_p0), %s263_s21, 4294967280  ;;  %p1576_p3 = scmp.eq.s32.totalorder %s1322_s10, 0 }
  0x69   : > { %1201 = dma.done.wait (%p1576_p3), [#allocation9], 12288   ;;  %p1577_p13 = pmov %p1576_p3 }
  0x6a   : > { %s298_s3 = sand.u32 1, %s1214_s28   ;;  %p1578_p10 = scmp.ne.s32.totalorder %s1322_s10, 0 }
  0x6b   : > { %1203 = vsyncadd (%p1577_p13), [#allocation9], 4294955008  ;;  %s1439_s16 = scalar_lea.vmem [#allocation11], %s298_s3 }
  0x6c   : > { %304 = sbr.rel (%p1578_p10) target bundleno = 115 (0x73), region = 60 }
  0x71   : > { %v305_v0 = vld [vmem:[%s1550_s2] sm:$0x1] }
  0x72   : > { %306 = vst [vmem:[#allocation2] sm:$0x1] %v305_v0 }
  0x73 PF: > { %v355_v1 = vld [vmem:[#allocation8 + $0x170] sm:$0xff]  ;;  %v354_v2 = vld [vmem:[#allocation8 + $0x168] sm:$0xff]  ;;  %v352_v3 = vld [vmem:[#allocation8 + $0x158] sm:$0xff]  ;;  %v1242_v5 = vmov 0.0   ;;  %vm1243_vm0 = vmmov 0   ;;  %s835_s20 = sshll.u32 %s1322_s10, 4 }
  0x74   : > { %374 = vmatprep.subr.mxu0 %v355_v1  ;;  %v351_v4 = vld [vmem:[#allocation8 + $0x150] sm:$0xff]  ;;  %872 = vmatprep.subr.mxu1 %v1242_v5  ;;  %v349_v6 = vld [vmem:[#allocation8 + $0x140] sm:$0xff]  ;;  %v348_v7 = vld [vmem:[#allocation8 + $0x138] sm:$0xff]  ;;  %s741_s26 = sshll.u32 %s1439_s16, 4  ;;  %s1501_s24 = scalar_lea.hbm %s1555_s7, %s835_s20  ;;  %s742_s26 = int_to_ptr.vmem [resolvable:$true] %s741_s26 }
  0x75   : > { %375 = vmatpush1.msra.mxu0 %v354_v2  ;;  %438 = vmatprep.mubr.f32.mxu0 %v1242_v5  ;;  %v346_v8 = vld [vmem:[#allocation8 + $0x128] sm:$0xff]  ;;  %v345_v9 = vld [vmem:[#allocation8 + $0x120] sm:$0xff]  ;;  %v343_v10 = vld [vmem:[#allocation8 + $0x110] sm:$0xff]  ;;  %s729_s9 = scalar_lea.sflag [#allocation7], %s298_s3  ;;  %s1140_s23 = scalar_lea.vmem %s742_s26, 16 }
  0x76   : > { %376 = vmatprep.subr.mxu0 %v352_v3  ;;  %904 = vmatprep.mubr.msk.f32.mxu1 %vm1243_vm0, %v1242_v5  ;;  %v342_v11 = vld [vmem:[#allocation8 + $0x108] sm:$0xff]  ;;  %v340_v12 = vld [vmem:[#allocation8 + $0xf8] sm:$0xff]  ;;  %v339_v13 = vld [vmem:[#allocation8 + $0xf0] sm:$0xff]  ;;  %p1141_p8 = scmp.ne.s32.totalorder %s742_s26, %s1140_s23  ;;  %p1579_p12 = scmp.ne.s32.totalorder %s1566_s17, 0 }
  0x77   : > { %377 = vmatpush1.msra.mxu0 %v351_v4  ;;  %v337_v14 = vld [vmem:[#allocation8 + $0xe0] sm:$0xff]  ;;  %v356_v15 = vld [vmem:[#allocation8 + $0x178] sm:$0xff]  ;;  %v334_v18 = vld [vmem:[#allocation8 + $0xc8] sm:$0xff]  ;;  %s1244_s21 = smov [#allocation11]  }
  0x78   : > { %378 = vmatprep.subr.mxu0 %v349_v6  ;;  %v336_v16 = vld [vmem:[#allocation8 + $0xd8] sm:$0xff]  ;;  %873 = vmatpush3.msra.mxu1 %v356_v15  ;;  %v353_v17 = vld [vmem:[#allocation8 + $0x160] sm:$0xff]  ;;  %v350_v19 = vld [vmem:[#allocation8 + $0x148] sm:$0xff]  ;;  %p1142_p1 = pnand %p1141_p8, %p1579_p12  ;;  %s1144_s10 = sshll.u32 %s1244_s21, 4  ;;  %s1145_s10 = int_to_ptr.vmem [resolvable:$false] %s1144_s10 }
  0x79   : > { %379 = vmatpush1.msra.mxu0 %v348_v7  ;;  %874 = vmatprep.subr.mxu1 %v1242_v5  ;;  %v333_v20 = vld [vmem:[#allocation8 + $0xc0] sm:$0xff]  ;;  %v331_v21 = vld [vmem:[#allocation8 + $0xb0] sm:$0xff]  ;;  %v330_v23 = vld [vmem:[#allocation8 + $0xa8] sm:$0xff]  ;;  %p1147_p11 = scmp.lt.s32.totalorder %s742_s26, %s1145_s10 }
  0x7a   : > { %380 = vmatprep.subr.mxu0 %v346_v8  ;;  %875 = vmatpush3.msra.mxu1 %v353_v17  ;;  %v347_v22 = vld [vmem:[#allocation8 + $0x130] sm:$0xff]  ;;  %v328_v24 = vld [vmem:[#allocation8 + $0x98] sm:$0xff]  ;;  %v325_v27 = vld [vmem:[#allocation8 + $0x80] sm:$0xff]  ;;  %p1143_p9 = pneg %p1142_p1 }
  0x7b   : > { %381 = vmatpush1.msra.mxu0 %v345_v9  ;;  %876 = vmatprep.subr.mxu1 %v1242_v5  ;;  %v344_v25 = vld [vmem:[#allocation8 + $0x118] sm:$0xff]  ;;  %v327_v26 = vld [vmem:[#allocation8 + $0x90] sm:$0xff]  ;;  %v341_v28 = vld [vmem:[#allocation8 + $0x100] sm:$0xff] }
  0x7c   : > { %382 = vmatprep.subr.mxu0 %v343_v10  ;;  %877 = vmatpush3.msra.mxu1 %v350_v19  ;;  %v324_v29 = vld [vmem:[#allocation8 + $0x78] sm:$0xff]  ;;  %v322_v30 = vld [vmem:[#allocation8 + $0x68] sm:$0xff]  ;;  %v321_v32 = vld [vmem:[#allocation8 + $0x60] sm:$0xff] }
  0x7d   : > { %383 = vmatpush1.msra.mxu0 %v342_v11  ;;  %878 = vmatprep.subr.mxu1 %v1242_v5  ;;  %v338_v31 = vld [vmem:[#allocation8 + $0xe8] sm:$0xff]  ;;  %v319_v33 = vld [vmem:[#allocation8 + $0x50] sm:$0xff]  ;;  %v316_v36 = vld [vmem:[#allocation8 + $0x38] sm:$0xff] }
  0x7e   : > { %384 = vmatprep.subr.mxu0 %v340_v12  ;;  %879 = vmatpush3.msra.mxu1 %v347_v22  ;;  %v335_v34 = vld [vmem:[#allocation8 + $0xd0] sm:$0xff]  ;;  %v318_v35 = vld [vmem:[#allocation8 + $0x48] sm:$0xff]  ;;  %v332_v37 = vld [vmem:[#allocation8 + $0xb8] sm:$0xff] }
  0x7f   : > { %385 = vmatpush1.msra.mxu0 %v339_v13  ;;  %880 = vmatprep.subr.mxu1 %v1242_v5  ;;  %v315_v38 = vld [vmem:[#allocation8 + $0x30] sm:$0xff]  ;;  %v313_v39 = vld [vmem:[#allocation8 + $0x20] sm:$0xff]  ;;  %v312_v41 = vld [vmem:[#allocation8 + $0x18] sm:$0xff] }
  0x80   : > { %386 = vmatprep.subr.mxu0 %v337_v14  ;;  %881 = vmatpush3.msra.mxu1 %v344_v25  ;;  %v329_v40 = vld [vmem:[#allocation8 + $0xa0] sm:$0xff]  ;;  %v310_v42 = vld [vmem:[#allocation8 + $0x8] sm:$0xff]  ;;  %v307_v45 = vld [vmem:[%s1426_s25] sm:$0x1]  ;;  %s1146_s25 = scalar_lea.vmem %s1145_s10, 32 }
  0x81   : > { %387 = vmatpush1.msra.mxu0 %v336_v16  ;;  %882 = vmatprep.subr.mxu1 %v1242_v5  ;;  %v326_v43 = vld [vmem:[#allocation8 + $0x88] sm:$0xff]  ;;  %v309_v44 = vld [vmem:[#allocation8] sm:$0xff]  ;;  %v561_v46 = vld [vmem:[#allocation10 + $0x170] sm:$0xff]  ;;  %p1148_p4 = scmp.lt.s32.totalorder %s1146_s25, %s1140_s23 }
  0x82   : > { %388 = vmatprep.subr.mxu0 %v334_v18  ;;  %883 = vmatpush3.msra.mxu1 %v341_v28  ;;  %v560_v47 = vld [vmem:[#allocation10 + $0x168] sm:$0xff]  ;;  %v323_v48 = vld [vmem:[#allocation8 + $0x70] sm:$0xff]  ;;  %v558_v49 = vld [vmem:[#allocation10 + $0x158] sm:$0xff] }
  0x83   : > { %389 = vmatpush1.msra.mxu0 %v333_v20  ;;  %884 = vmatprep.subr.mxu1 %v1242_v5  ;;  %v557_v50 = vld [vmem:[#allocation10 + $0x150] sm:$0xff]  ;;  %v320_v51 = vld [vmem:[#allocation8 + $0x58] sm:$0xff]  ;;  %v555_v52 = vld [vmem:[#allocation10 + $0x140] sm:$0xff]  ;;  %p1149_p7 = por %p1148_p4, %p1147_p11 }
  0x84   : > { %390 = vmatprep.subr.mxu0 %v331_v21  ;;  %885 = vmatpush3.msra.mxu1 %v338_v31  ;;  %v554_v53 = vld [vmem:[#allocation10 + $0x138] sm:$0xff]  ;;  %v317_v54 = vld [vmem:[#allocation8 + $0x40] sm:$0xff]  ;;  %v552_v55 = vld [vmem:[#allocation10 + $0x128] sm:$0xff] }
  0x85   : > { %391 = vmatpush1.msra.mxu0 %v330_v23  ;;  %886 = vmatprep.subr.mxu1 %v1242_v5  ;;  %v551_v56 = vld [vmem:[#allocation10 + $0x120] sm:$0xff]  ;;  %v314_v57 = vld [vmem:[#allocation8 + $0x28] sm:$0xff]  ;;  %v549_v58 = vld [vmem:[#allocation10 + $0x110] sm:$0xff]  ;;  %p1150_p2 = pnand %p1149_p7, %p1143_p9 }
  0x86   : > { %392 = vmatprep.subr.mxu0 %v328_v24  ;;  %887 = vmatpush3.msra.mxu1 %v335_v34  ;;  %v548_v59 = vld [vmem:[#allocation10 + $0x108] sm:$0xff]  ;;  %v311_v60 = vld [vmem:[#allocation8 + $0x10] sm:$0xff]  ;;  %v546_v61 = vld [vmem:[#allocation10 + $0xf8] sm:$0xff] }
  0x87   : > { %393 = vmatpush1.msra.mxu0 %v327_v26  ;;  %888 = vmatprep.subr.mxu1 %v1242_v5  ;;  %v545_v62 = vld [vmem:[#allocation10 + $0xf0] sm:$0xff]  ;;  %v543_v63 = vld [vmem:[#allocation10 + $0xe0] sm:$0xff]  ;;  %v542_v0 = vld [vmem:[#allocation10 + $0xd8] sm:$0xff] }
  0x88   : > { %394 = vmatprep.subr.mxu0 %v325_v27  ;;  %889 = vmatpush3.msra.mxu1 %v332_v37  ;;  %v562_v1 = vld [vmem:[#allocation10 + $0x178] sm:$0xff]  ;;  %v540_v2 = vld [vmem:[#allocation10 + $0xc8] sm:$0xff]  ;;  %v539_v3 = vld [vmem:[#allocation10 + $0xc0] sm:$0xff] }
  0x89   : > { %395 = vmatpush1.msra.mxu0 %v324_v29  ;;  %890 = vmatprep.subr.mxu1 %v1242_v5  ;;  %v559_v4 = vld [vmem:[#allocation10 + $0x160] sm:$0xff]  ;;  %v537_v6 = vld [vmem:[#allocation10 + $0xb0] sm:$0xff]  ;;  %v536_v7 = vld [vmem:[#allocation10 + $0xa8] sm:$0xff] }
  0x8a   : > { %396 = vmatprep.subr.mxu0 %v322_v30  ;;  %891 = vmatpush3.msra.mxu1 %v329_v40  ;;  %v556_v8 = vld [vmem:[#allocation10 + $0x148] sm:$0xff]  ;;  %v534_v9 = vld [vmem:[#allocation10 + $0x98] sm:$0xff]  ;;  %v533_v10 = vld [vmem:[#allocation10 + $0x90] sm:$0xff] }
  0x8b   : > { %397 = vmatpush1.msra.mxu0 %v321_v32  ;;  %892 = vmatprep.subr.mxu1 %v1242_v5  ;;  %v553_v11 = vld [vmem:[#allocation10 + $0x130] sm:$0xff]  ;;  %v531_v12 = vld [vmem:[#allocation10 + $0x80] sm:$0xff]  ;;  %v530_v13 = vld [vmem:[#allocation10 + $0x78] sm:$0xff] }
  0x8c   : > { %398 = vmatprep.subr.mxu0 %v319_v33  ;;  %893 = vmatpush3.msra.mxu1 %v326_v43  ;;  %v550_v14 = vld [vmem:[#allocation10 + $0x118] sm:$0xff]  ;;  %v528_v15 = vld [vmem:[#allocation10 + $0x68] sm:$0xff]  ;;  %v527_v16 = vld [vmem:[#allocation10 + $0x60] sm:$0xff] }
  0x8d   : > { %399 = vmatpush1.msra.mxu0 %v318_v35  ;;  %894 = vmatprep.subr.mxu1 %v1242_v5  ;;  %v547_v17 = vld [vmem:[#allocation10 + $0x100] sm:$0xff]  ;;  %v525_v18 = vld [vmem:[#allocation10 + $0x50] sm:$0xff]  ;;  %v524_v19 = vld [vmem:[#allocation10 + $0x48] sm:$0xff] }
  0x8e   : > { %400 = vmatprep.subr.mxu0 %v316_v36  ;;  %895 = vmatpush3.msra.mxu1 %v323_v48  ;;  %v544_v20 = vld [vmem:[#allocation10 + $0xe8] sm:$0xff]  ;;  %v522_v21 = vld [vmem:[#allocation10 + $0x38] sm:$0xff]  ;;  %v521_v22 = vld [vmem:[#allocation10 + $0x30] sm:$0xff] }
  0x8f   : > { %401 = vmatpush1.msra.mxu0 %v315_v38  ;;  %896 = vmatprep.subr.mxu1 %v1242_v5  ;;  %v541_v23 = vld [vmem:[#allocation10 + $0xd0] sm:$0xff]  ;;  %v519_v24 = vld [vmem:[#allocation10 + $0x20] sm:$0xff]  ;;  %v518_v25 = vld [vmem:[#allocation10 + $0x18] sm:$0xff] }
  0x90   : > { %402 = vmatprep.subr.mxu0 %v313_v39  ;;  %897 = vmatpush3.msra.mxu1 %v320_v51  ;;  %v538_v26 = vld [vmem:[#allocation10 + $0xb8] sm:$0xff]  ;;  %v516_v27 = vld [vmem:[#allocation10 + $0x8] sm:$0xff]  ;;  %v515_v28 = vld [vmem:[#allocation10] sm:$0xff]  ;;  %v359_v39 = vlaneseq }
  0x91   : > { %403 = vmatpush1.msra.mxu0 %v312_v41  ;;  %898 = vmatprep.subr.mxu1 %v1242_v5  ;;  %v535_v29 = vld [vmem:[#allocation10 + $0xa0] sm:$0xff]  ;;  %v1476_v30 = vld [vmem:[#allocation2] sm:$0x1]  ;;  %v532_v31 = vld [vmem:[#allocation10 + $0x88] sm:$0xff] }
  0x92   : > { %404 = vmatprep.subr.mxu0 %v310_v42  ;;  %899 = vmatpush3.msra.mxu1 %v317_v54  ;;  %v529_v32 = vld [vmem:[#allocation10 + $0x70] sm:$0xff]  ;;  %v526_v33 = vld [vmem:[#allocation10 + $0x58] sm:$0xff]  ;;  %v523_v34 = vld [vmem:[#allocation10 + $0x40] sm:$0xff]  ;;  %v360_v40 = vshrl.u32 %v359_v39, 7 }
  0x93   : > { %405 = vmatpush1.msra.mxu0 %v309_v44  ;;  %900 = vmatprep.subr.mxu1 %v1242_v5  ;;  %v520_v35 = vld [vmem:[#allocation10 + $0x28] sm:$0xff]  ;;  %v517_v36 = vld [vmem:[#allocation10 + $0x10] sm:$0xff]  ;;  %v357_v42 = vld [vmem:[%s1553_s5] sm:$0x7] }
  0x94   : > { %439 = vmatmul.mubr.f32.vlgmr.msra.gmra.mxu0 %v307_v45  ;;  %563 = vmatprep.subr.mxu0 %v561_v46  ;;  %v361_v41 = vsub.s32 0, %v360_v40 }
  0x95   : > { %564 = vmatpush1.msra.mxu0 %v560_v47  ;;  %901 = vmatpush3.msra.mxu1 %v314_v57 }
  0x96   : > { %565 = vmatprep.subr.mxu0 %v558_v49  ;;  %902 = vmatprep.subr.mxu1 %v1242_v5  ;;  %v362_v44 = vrot.slane %v357_v42, %v361_v41  ;;  %v365_v49 = vsub.s32 1, %v360_v40 }
  0x97   : > { %566 = vmatpush1.msra.mxu0 %v557_v50  ;;  %903 = vmatpush3.msra.mxu1 %v311_v60  ;;  %v718_v60 = vld [vmem:[%s1554_s6] sm:$0x1] }
  0x98   : > { %567 = vmatprep.subr.mxu0 %v555_v52  ;;  %907 = vmatprep.subr.mxu1 %v1242_v5  ;;  %v366_v50 = vrot.slane %v357_v42, %v365_v49 }
  0x99   : > { %568 = vmatpush1.msra.mxu0 %v554_v53  ;;  %905 = vmatmul.mubr.f32.vlgmr.msra.gmra.mxu1 %v307_v45 }
  0x9a   : > { %569 = vmatprep.subr.mxu0 %v552_v55  ;;  %627 = vmatprep.mubr.f32.mxu0 %v1242_v5 }
  0x9b   : > { %570 = vmatpush1.msra.mxu0 %v551_v56  ;;  %908 = vmatpush3.msra.mxu1 %v562_v1 }
  0x9c   : > { %571 = vmatprep.subr.mxu0 %v549_v58  ;;  %909 = vmatprep.subr.mxu1 %v1242_v5 }
  0x9d   : > { %572 = vmatpush1.msra.mxu0 %v548_v59  ;;  %910 = vmatpush3.msra.mxu1 %v559_v4  ;;  %v369_v59 = vsub.s32 2, %v360_v40 }
  0x9e   : > { %573 = vmatprep.subr.mxu0 %v546_v61  ;;  %911 = vmatprep.subr.mxu1 %v1242_v5 }
  0x9f   : > { %574 = vmatpush1.msra.mxu0 %v545_v62  ;;  %912 = vmatpush3.msra.mxu1 %v556_v8  ;;  %v370_v61 = vrot.slane %v357_v42, %v369_v59 }
  0xa0   : > { %575 = vmatprep.subr.mxu0 %v543_v63  ;;  %913 = vmatprep.subr.mxu1 %v1242_v5 }
  0xa1   : > { %576 = vmatpush1.msra.mxu0 %v542_v0  ;;  %914 = vmatpush3.msra.mxu1 %v553_v11 }
  0xa2   : > { %577 = vmatprep.subr.mxu0 %v540_v2  ;;  %915 = vmatprep.subr.mxu1 %v1242_v5 }
  0xa3   : > { %578 = vmatpush1.msra.mxu0 %v539_v3  ;;  %916 = vmatpush3.msra.mxu1 %v550_v14 }
  0xa4   : > { %579 = vmatprep.subr.mxu0 %v537_v6  ;;  %917 = vmatprep.subr.mxu1 %v1242_v5 }
  0xa5   : > { %580 = vmatpush1.msra.mxu0 %v536_v7  ;;  %918 = vmatpush3.msra.mxu1 %v547_v17 }
  0xa6   : > { %581 = vmatprep.subr.mxu0 %v534_v9  ;;  %919 = vmatprep.subr.mxu1 %v1242_v5 }
  0xa7   : > { %582 = vmatpush1.msra.mxu0 %v533_v10  ;;  %920 = vmatpush3.msra.mxu1 %v544_v20 }
  0xa8   : > { %583 = vmatprep.subr.mxu0 %v531_v12  ;;  %921 = vmatprep.subr.mxu1 %v1242_v5 }
  0xa9   : > { %584 = vmatpush1.msra.mxu0 %v530_v13  ;;  %922 = vmatpush3.msra.mxu1 %v541_v23 }
  0xaa   : > { %585 = vmatprep.subr.mxu0 %v528_v15  ;;  %923 = vmatprep.subr.mxu1 %v1242_v5 }
  0xab   : > { %586 = vmatpush1.msra.mxu0 %v527_v16  ;;  %924 = vmatpush3.msra.mxu1 %v538_v26 }
  0xac   : > { %587 = vmatprep.subr.mxu0 %v525_v18  ;;  %925 = vmatprep.subr.mxu1 %v1242_v5 }
  0xad   : > { %588 = vmatpush1.msra.mxu0 %v524_v19  ;;  %926 = vmatpush3.msra.mxu1 %v535_v29 }
  0xae   : > { %589 = vmatprep.subr.mxu0 %v522_v21  ;;  %927 = vmatprep.subr.mxu1 %v1242_v5 }
  0xaf   : > { %590 = vmatpush1.msra.mxu0 %v521_v22  ;;  %928 = vmatpush3.msra.mxu1 %v532_v31 }
  0xb0   : > { %591 = vmatprep.subr.mxu0 %v519_v24  ;;  %939 = vmatprep.mubr.msk.f32.mxu1 %vm1243_vm0, %v1242_v5 }
  0xb1   : > { %592 = vmatpush1.msra.mxu0 %v518_v25  ;;  %929 = vmatprep.subr.mxu1 %v1242_v5 }
  0xb2   : > { %593 = vmatprep.subr.mxu0 %v516_v27  ;;  %930 = vmatpush3.msra.mxu1 %v529_v32 }
  0xb3   : > { %594 = vmatpush1.msra.mxu0 %v515_v28  ;;  %931 = vmatprep.subr.mxu1 %v1242_v5 }
  0xb4   : > { %628 = vmatmul.mubr.f32.vlgmr.msra.gmra.mxu0 %v1476_v30  ;;  %932 = vmatpush3.msra.mxu1 %v526_v33 }
  0xb5   : > { %933 = vmatprep.subr.mxu1 %v1242_v5 }
  0xb6   : > { %934 = vmatpush3.msra.mxu1 %v523_v34 }
  0xb7   : > { %935 = vmatprep.subr.mxu1 %v1242_v5 }
  0xb8   : > { %936 = vmatpush3.msra.mxu1 %v520_v35 }
  0xb9   : > { %937 = vmatprep.subr.mxu1 %v1242_v5 }
  0xba   : > { %938 = vmatpush3.msra.mxu1 %v517_v36 }
  0xbb   : > { %940 = vmatmul.mubr.f32.vlgmr.msra.gmra.mxu1 %v1476_v30 }
 0x154   : > { %v440_v43 = vpop.f32.mrf.mxu0 }
 0x155   : > { %v441_v46 = vadd.f32 %v440_v43, %v362_v44 }
 0x156   : > { %v442_v45 = vpop.f32.mrf.mxu0 }
 0x157   : > { %v443_v52 = vadd.f32 %v442_v45, %v366_v50 }
 0x159   : > { %v511_v37 = vpop.f32.mrf.mxu1 }
 0x15a   : > { %v512_v1 = vadd.f32 %v511_v37, %v370_v61 }
 0x15b   : > { %v906_v38 = vpop.f32.mrf.mxu1 }
 0x174   : > { %v629_v47 = vpop.f32.mrf.mxu0 }
 0x175   : > { %v704_v48 = vadd.f32 %v629_v47, %v441_v46 }
 0x176   : > { %v631_v51 = vpop.f32.mrf.mxu0 }
 0x177   : > { %v833_v5 = vmul.f32 -1.442695, %v704_v48  ;;  %v711_v53 = vadd.f32 %v631_v51, %v443_v52 }
 0x179   : > { %1042 = vpow2.f32 %v833_v5  ;;  %v834_v56 = vmul.f32 -1.442695, %v711_v53 }
 0x17b   : > { %v700_v54 = vpop.f32.mrf.mxu1  ;;  %1044 = vpow2.f32 %v834_v56 }
 0x17c   : > { %v719_v62 = vadd.f32 %v718_v60, %v700_v54 }
 0x17d   : > { %v941_v55 = vpop.f32.mrf.mxu1 }
 0x186   : > { %v1043_v57 = vpop.eup %1042 }
 0x187   : > { %v708_v58 = vadd.f32 1.0, %v1043_v57 }
 0x188   : > { %v1045_v63 = vpop.eup %1044 }
 0x189   : > { %1046 = vrcp.f32 %v708_v58  ;;  %v715_v3 = vadd.f32 1.0, %v1045_v63 }
 0x196   : > { %v1047_v0 = vpop.eup %1046 }
 0x197   : > { %v720_v2 = vmul.f32 %v1047_v0, %v719_v62 }
 0x199   : > { %v721_v4 = vadd.f32 %v720_v2, %v512_v1 }
 0x19b   : > { %1048 = vtanh.f32 %v721_v4 }
 0x19c   : > { %1050 = vrcp.f32 %v715_v3 }
 0x1a8   : > { %v1049_v6 = vpop.eup %1048 }
 0x1a9   : > { %v723_v7 = vsub.f32 %v1476_v30, %v1049_v6  ;;  %v1051_v8 = vpop.eup %1050 }
 0x1ab   : > { %v724_v9 = vmul.f32 %v1051_v8, %v723_v7 }
 0x1ad   : > { %v725_v10 = vadd.f32 %v1049_v6, %v724_v9 }
 0x1af   : > { %726 = vst [vmem:[#allocation2] sm:$0x1] %v725_v10  ;;  %727 = vst [vmem:[%s1439_s16] sm:$0x1] %v725_v10 }
 0x1b0   : > { %1153 = shalt.err (!%p1150_p2)
}
 0x1b1   : > { %s1154_s16 = scalar_lea.hbm %s1501_s24, 16  ;;  %s1158_s30 = scalar_lea.hbm %s1555_s7, 128 }
 0x1b2   : > { %p1155_p5 = scmp.ne.s32.totalorder %s1501_s24, %s1154_s16  ;;  %p1159_p3 = scmp.lt.s32.totalorder %s1501_s24, %s1555_s7 }
 0x1b3   : > { %p1160_p13 = scmp.lt.s32.totalorder %s1158_s30, %s1154_s16 }
 0x1b4   : > { %p1156_p6 = pnand %p1155_p5, %p1579_p12 }
 0x1b5   : > { %p1161_p10 = por %p1160_p13, %p1159_p3 }
 0x1b6   : > { %p1157_p0 = pneg %p1156_p6 }
 0x1b8   : > { %p1162_p8 = pnand %p1161_p10, %p1157_p0 }
 0x1ba   : > { %1165 = shalt.err (!%p1162_p8)
}
 0x1bb   : > { %954 = dma.vmem_to_hbm [thread:$0]  (%p1579_p12), %s742_s26, 16, %s1501_s24, %s729_s9  }
 0x1bc PF: > { %p978_p1 = scmp.ge.s32.totalorder %s1234_s0, 2  ;;  %s753_s22 = sand.u32 1, %s1210_s27  }
 0x1bd   : > { %p1580_p9 = scmp.ne.s32.totalorder %s1567_s18, 0  ;;  %s754_s11 = scalar_lea.sflag [#allocation7], %s753_s22 }
 0x1bf   : > { %p970_p11 = pnand %p978_p1, %p1580_p9 }
 0x1c1   : > { %p971_p4 = pneg %p970_p11 }
 0x1c3   : > { %1205 = dma.done.wait (%p971_p4), %s754_s11, 16  }
 0x1c4   : > { %1207 = vsyncadd (%p971_p4), %s754_s11, 4294967280  ;;  %s1581_s20 = sld [smem:[#allocation19_spill]]  ;;  %p25_p12 = scmp.ge.s32.totalorder %s1326_s12, 10  }
 0x1c5   : > { %s1582_s17 = sld [smem:[#allocation18_spill]]  ;;  %s1584_s27 = smov %s1214_s28 }
 0x1c6   : > { %s1583_s9 = sld [smem:[#allocation20_spill]]  ;;  %s1585_s28 = smov %s1218_s29 }
 0x1c7   : > { %s1587_s30 = smov %s1226_s8  ;;  %s1589_s0 = smov %s1326_s12 }
 0x1c8   :  { %27 = sbr.rel (!%p25_p12) target bundleno = 15 (0xf), region = 101 }
 0x1ca   : > { %s1586_s29 = smov %s1581_s20 }
 0x1cb   : > { %s1588_s8 = smov %s1582_s17 }
 0x1cd   :  { %758 = vsyncpa [#allocation6], 1 }
 0x1ce   :  { %760 = vsyncpa [#allocation6 + $0x1], 1 }
 0x1cf   :  { %761 = vsyncpa [#allocation9], 1 }
 0x1d0   :  { %762 = vsyncpa [#allocation7], 1 }
 0x1d1   :  { %764 = vsyncpa [#allocation7 + $0x1], 1 }

</bundles_post_ra>
